<compile_context>
chip_gen: v6e
topology: v6e:2x2x1
jax: 0.10.0
libtpu: 0.0.40
codegen_flags: <defaults>
</compile_context>

<pallas_src>
import numpy as np
import jax
import jax.numpy as jnp
from jax.experimental import pallas as pl
from jax.experimental.pallas import tpu as pltpu

# real / lane-padded hidden widths
H1, H2, H3 = 600, 400, 200
H1P, H2P, H3P = 640, 512, 256


def _round_up(x, m):
    return ((x + m - 1) // m) * m


def _choose_b_tile(B, b_tile_max):
    """Batch tile: big enough to amortize ~0.35us/step grid overhead, but
    always >= 2 grid steps once B > 256 (v7x dual-TensorCore sharding)."""
    if B <= 256:
        return _round_up(B, 8)
    half = (B + 1) // 2
    if half <= 256:
        return _round_up(half, 8)          # 2 steps, minimal padding
    return min(b_tile_max, _round_up(half, 256))


# ----------------------------------------------------------------------------
# Kernel: one batch tile, fully fused forward.
#   3 MXU matmuls (bf16 x bf16 -> f32 accumulate) + VPU/XLU final layer.
# ----------------------------------------------------------------------------
def critic_kernel(s_ref, a_ref,
                  w1_ref, b1_ref,
                  w2_ref, b2_ref,
                  w3_ref, b3_ref,
                  w4_ref, b4_ref,
                  o_ref,
                  x2_ref):                      # VMEM scratch (B_TILE, H2P) bf16
    f32, bf16 = jnp.float32, jnp.bfloat16
    A = a_ref.shape[1]

    # layer 0: S -> 640 (600 real).  K=S is short; kept on the MXU (see header).
    x1 = jnp.tanh(jnp.dot(s_ref[...].astype(bf16), w1_ref[...],
                          preferred_element_type=f32) + b1_ref[...]).astype(bf16)

    # layer 1: 640 -> 512.  Real output columns live at A..A+399; columns
    # 0..A-1 (and 404..511) are guaranteed zero (zero weight cols + zero bias).
    x2 = jnp.tanh(jnp.dot(x1, w2_ref[...],
                          preferred_element_type=f32) + b2_ref[...]).astype(bf16)

    # layer 2: cat(x, action) @ W3 as ONE MXU matmul.
    # Write the layer-1 tanh output to the bf16 scratch, then overwrite the
    # guaranteed-zero columns 0..A-1 with the action (lane-aligned masked
    # store, no lane rotation).  W3's action rows sit at K rows 0..A-1, so the
    # action contribution rides on K rows the MXU was already pushing as zeros.
    x2_ref[...] = x2
    x2_ref[:, :A] = a_ref[...].astype(bf16)
    x3 = jnp.tanh(jnp.dot(x2_ref[...], w3_ref[...],
                          preferred_element_type=f32) + b3_ref[...])

    # layer 3: 256 -> 1 on VPU + XLU lane-reduce (keeps an N=1 push off the MXU).
    y = jnp.tanh(jnp.sum(x3 * w4_ref[...], axis=-1, keepdims=True) + b4_ref[...])
    o_ref[...] = y.astype(o_ref.dtype)


# ----------------------------------------------------------------------------
# Wrapper: batch-tiled 1-D grid, weights VMEM-resident across grid steps.
# ----------------------------------------------------------------------------
def critic_forward(state, action, params, b_tile_max=1024):
    """state: (B, S) f32, action: (B, A) f32 -> (B, 1) f32."""
    (w1, b1, w2, b2, w3, b3, w4, b4) = params
    B, S = state.shape
    A = action.shape[1]

    B_TILE = _choose_b_tile(B, b_tile_max)
    Bp = _round_up(B, B_TILE)
    if Bp != B:
        state = jnp.pad(state, ((0, Bp - B), (0, 0)))
        action = jnp.pad(action, ((0, Bp - B), (0, 0)))
    grid = (Bp // B_TILE,)

    def batch_spec(d):
        return pl.BlockSpec((B_TILE, d), lambda i: (i, 0))

    def resident_spec(arr):
        # full-array block, same block index every step -> DMA'd once, resident.
        return pl.BlockSpec(arr.shape, lambda i: (0, 0))

    out = pl.pallas_call(
        critic_kernel,
        out_shape=jax.ShapeDtypeStruct((Bp, 1), jnp.float32),
        grid=grid,
        in_specs=[batch_spec(S), batch_spec(A),
                  resident_spec(w1), resident_spec(b1),
                  resident_spec(w2), resident_spec(b2),
                  resident_spec(w3), resident_spec(b3),
                  resident_spec(w4), resident_spec(b4)],
        out_specs=batch_spec(1),        # 1-lane output; payload is tiny (4 B/row)
        scratch_shapes=[pltpu.VMEM((B_TILE, H2P), jnp.bfloat16)],
        compiler_params=pltpu.CompilerParams(
            dimension_semantics=("parallel",),
            # 32 MiB: above v5e's 16 MiB scoped default (needed for the bigger
            # tile), equal to the v6e/v7x defaults, well under any physical VMEM.
            vmem_limit_bytes=32 * 1024 * 1024),
    )(state, action, w1, b1, w2, b2, w3, b3, w4, b4)
    return out[:B]


# ----------------------------------------------------------------------------
# Parameter init mirroring PyTorch reset_parameters():
#   hidden layers: weights ~ U(-1/sqrt(weight.size(0)), +...)  (== out_features)
#   last layer:    weights ~ U(-3e-3, 3e-3)
#   biases:        default nn.Linear init, U(-1/sqrt(in_features), +...)
# (Same distributions as torch, not bit-identical to torch.manual_seed.)
# Kernel params are stored transposed (in, out), zero-padded to lane multiples,
# big weights cast to bf16.  Layer-1 output columns are shifted by A so that
# columns 0..A-1 stay zero (action slot); W3's action rows go to K rows 0..A-1.
# Also returns the raw f32 params for an exact-math reference.
# ----------------------------------------------------------------------------
def init_params(key, state_size, action_size):
    S, A = state_size, action_size
    in_out = [(S, H1), (H1, H2), (H2 + A, H3), (H3, 1)]

    keys = jax.random.split(key, 8)
    ws, bs = [], []
    for i, (fin, fout) in enumerate(in_out):
        wlim = (1.0 / np.sqrt(fout)) if i < 3 else 3e-3
        blim = 1.0 / np.sqrt(fin)
        ws.append(jax.random.uniform(keys[2 * i], (fin, fout),
                                     jnp.float32, -wlim, wlim))
        bs.append(jax.random.uniform(keys[2 * i + 1], (1, fout),
                                     jnp.float32, -blim, blim))

    # layer 0: (S, 600) -> (S, 640)
    w1 = jnp.pad(ws[0], ((0, 0), (0, H1P - H1))).astype(jnp.bfloat16)
    b1 = jnp.pad(bs[0], ((0, 0), (0, H1P - H1)))

    # layer 1: real output columns at A..A+399 (columns 0..A-1 reserved for action)
    w2 = jnp.zeros((H1P, H2P), jnp.float32).at[:H1, A:A + H2].set(ws[1])
    w2 = w2.astype(jnp.bfloat16)
    b2 = jnp.zeros((1, H2P), jnp.float32).at[:, A:A + H2].set(bs[1])

    # layer 2: combined weight.  torch cat order is (x, action): rows 0..399 of
    # ws[2] are the state part, rows 400..403 the action part.  Padded layout:
    # K rows 0..A-1 = action rows, K rows A..A+399 = state rows, rest zero.
    w3 = jnp.zeros((H2P, H3P), jnp.float32)
    w3 = w3.at[:A, :H3].set(ws[2][H2:, :])
    w3 = w3.at[A:A + H2, :H3].set(ws[2][:H2, :])
    w3 = w3.astype(jnp.bfloat16)
    b3 = jnp.pad(bs[2], ((0, 0), (0, H3P - H3)))

    # layer 3: tiny, kept f32; stored as a (1, 256) row for the VPU mul+reduce.
    w4 = jnp.pad(ws[3].T, ((0, 0), (0, H3P - H3)))
    b4 = bs[3]

    kernel_params = (w1, b1, w2, b2, w3, b3, w4, b4)
    raw_params = (ws, bs)
    return kernel_params, raw_params


# ----------------------------------------------------------------------------
# References.
#  * critic_reference_bf16: mirrors the kernel math exactly (same bf16 casts).
#  * critic_reference_f32:  mirrors the original f32 PyTorch forward; the bf16
#    kernel deviates from it by at most a few 1e-3 absolute (documented).
# ----------------------------------------------------------------------------
def critic_reference_bf16(state, action, kparams):
    (w1, b1, w2, b2, w3, b3, w4, b4) = kparams
    f32, bf16 = jnp.float32, jnp.bfloat16
    A = action.shape[1]
    x1 = jnp.tanh(jnp.dot(state.astype(bf16), w1,
                          preferred_element_type=f32) + b1).astype(bf16)
    x2 = jnp.tanh(jnp.dot(x1, w2, preferred_element_type=f32) + b2).astype(bf16)
    x2 = x2.at[:, :A].set(action.astype(bf16))
    x3 = jnp.tanh(jnp.dot(x2, w3, preferred_element_type=f32) + b3)
    return jnp.tanh(jnp.sum(x3 * w4, axis=-1, keepdims=True) + b4)


def critic_reference_f32(state, action, raw_params):
    ws, bs = raw_params
    x = state
    for i in range(4):
        if i == 2:
            x = jnp.concatenate([x, action], axis=1)
        x = jnp.tanh(x @ ws[i] + bs[i])
    return x


if __name__ == "__main__":
    B = 2
    STATE_SIZE = 32
    ACTION_SIZE = 4

    key = jax.random.PRNGKey(0)
    k_s, k_a, k_p = jax.random.split(key, 3)

    state = jax.random.normal(k_s, (B, STATE_SIZE), jnp.float32)
    action = jax.random.normal(k_a, (B, ACTION_SIZE), jnp.float32)
    kparams, raw = init_params(k_p, STATE_SIZE, ACTION_SIZE)

    out = jax.block_until_ready(critic_forward(state, action, kparams))

    ref_bf16 = critic_reference_bf16(state, action, kparams)
    ref_f32 = critic_reference_f32(state, action, raw)

    # exact-math check against the bf16-mirrored reference
    np.testing.assert_allclose(np.asarray(out), np.asarray(ref_bf16),
                               rtol=2e-3, atol=2e-3)
    # documented bf16-vs-f32 deviation check against the true f32 module math
    np.testing.assert_allclose(np.asarray(out), np.asarray(ref_f32),
                               rtol=0.0, atol=3e-2)
    assert out.shape == (B, 1)

    print("KERNEL_OK")
</pallas_src>

<mosaic_0001>
module attributes {stable_mosaic.version = 11 : i64} {
  func.func @critic_kernel(%arg0: i32, %arg1: memref<8x32xf32, #tpu.memory_space<vmem>>, %arg2: memref<8x4xf32, #tpu.memory_space<vmem>>, %arg3: memref<32x640xbf16, #tpu.memory_space<vmem>>, %arg4: memref<1x640xf32, #tpu.memory_space<vmem>>, %arg5: memref<640x512xbf16, #tpu.memory_space<vmem>>, %arg6: memref<1x512xf32, #tpu.memory_space<vmem>>, %arg7: memref<512x256xbf16, #tpu.memory_space<vmem>>, %arg8: memref<1x256xf32, #tpu.memory_space<vmem>>, %arg9: memref<1x256xf32, #tpu.memory_space<vmem>>, %arg10: memref<1x1xf32, #tpu.memory_space<vmem>>, %arg11: memref<8x1xf32, #tpu.memory_space<vmem>>, %arg12: memref<8x512xbf16, #tpu.memory_space<vmem>>) attributes {dimension_semantics = [#tpu.dimension_semantics<parallel>], iteration_bounds = array<i64: 1>, scalar_prefetch = 0 : i64, scratch_operands = 1 : i64, tpu.core_type = #tpu.core_type<tc>, window_params = [{transform_indices = @transform_0, window_bounds = array<i64: 8, 32>}, {transform_indices = @transform_1, window_bounds = array<i64: 8, 4>}, {pipeline_mode = #tpu.pipeline_mode<synchronous>, transform_indices = @transform_2, window_bounds = array<i64: 32, 640>}, {pipeline_mode = #tpu.pipeline_mode<synchronous>, transform_indices = @transform_3, window_bounds = array<i64: 1, 640>}, {pipeline_mode = #tpu.pipeline_mode<synchronous>, transform_indices = @transform_4, window_bounds = array<i64: 640, 512>}, {pipeline_mode = #tpu.pipeline_mode<synchronous>, transform_indices = @transform_5, window_bounds = array<i64: 1, 512>}, {pipeline_mode = #tpu.pipeline_mode<synchronous>, transform_indices = @transform_6, window_bounds = array<i64: 512, 256>}, {pipeline_mode = #tpu.pipeline_mode<synchronous>, transform_indices = @transform_7, window_bounds = array<i64: 1, 256>}, {pipeline_mode = #tpu.pipeline_mode<synchronous>, transform_indices = @transform_8, window_bounds = array<i64: 1, 256>}, {pipeline_mode = #tpu.pipeline_mode<synchronous>, transform_indices = @transform_9, window_bounds = array<i64: 1, 1>}, {transform_indices = @transform_10, window_bounds = array<i64: 8, 1>}]} {
    %c0 = arith.constant 0 : index
    %c0_0 = arith.constant 0 : index
    %0 = vector.load %arg1[%c0, %c0_0] : memref<8x32xf32, #tpu.memory_space<vmem>>, vector<8x32xf32>
    %1 = arith.truncf %0 : vector<8x32xf32> to vector<8x32xbf16>
    %c0_1 = arith.constant 0 : index
    %c0_2 = arith.constant 0 : index
    %2 = vector.load %arg3[%c0_1, %c0_2] : memref<32x640xbf16, #tpu.memory_space<vmem>>, vector<32x640xbf16>
    %cst = arith.constant dense<0.000000e+00> : vector<8x640xf32>
    %3 = tpu.matmul %1, %2, %cst {dimension_numbers = #tpu.dot_dimension_numbers<[1], [0], [0], [1], [0, 0, 1, 1], [], []>} : vector<8x32xbf16>, vector<32x640xbf16>, vector<8x640xf32> -> vector<8x640xf32>
    %c0_3 = arith.constant 0 : index
    %c0_4 = arith.constant 0 : index
    %4 = vector.load %arg4[%c0_3, %c0_4] : memref<1x640xf32, #tpu.memory_space<vmem>>, vector<1x640xf32>
    %5 = vector.broadcast %4 : vector<1x640xf32> to vector<8x640xf32>
    %6 = arith.addf %3, %5 : vector<8x640xf32>
    %7 = math.tanh %6 : vector<8x640xf32>
    %8 = arith.truncf %7 : vector<8x640xf32> to vector<8x640xbf16>
    %c0_5 = arith.constant 0 : index
    %c0_6 = arith.constant 0 : index
    %9 = vector.load %arg5[%c0_5, %c0_6] : memref<640x512xbf16, #tpu.memory_space<vmem>>, vector<640x512xbf16>
    %cst_7 = arith.constant dense<0.000000e+00> : vector<8x512xf32>
    %10 = tpu.matmul %8, %9, %cst_7 {dimension_numbers = #tpu.dot_dimension_numbers<[1], [0], [0], [1], [0, 0, 1, 1], [], []>} : vector<8x640xbf16>, vector<640x512xbf16>, vector<8x512xf32> -> vector<8x512xf32>
    %c0_8 = arith.constant 0 : index
    %c0_9 = arith.constant 0 : index
    %11 = vector.load %arg6[%c0_8, %c0_9] : memref<1x512xf32, #tpu.memory_space<vmem>>, vector<1x512xf32>
    %12 = vector.broadcast %11 : vector<1x512xf32> to vector<8x512xf32>
    %13 = arith.addf %10, %12 : vector<8x512xf32>
    %14 = math.tanh %13 : vector<8x512xf32>
    %15 = arith.truncf %14 : vector<8x512xf32> to vector<8x512xbf16>
    %c0_10 = arith.constant 0 : index
    %c0_11 = arith.constant 0 : index
    %16 = vector.load %arg12[%c0_10, %c0_11] : memref<8x512xbf16, #tpu.memory_space<vmem>>, vector<8x512xbf16>
    tpu.vector_store %arg12[%c0_10, %c0_11], %15 {strides = array<i32>} : memref<8x512xbf16, #tpu.memory_space<vmem>>, vector<8x512xbf16>,
    %c0_12 = arith.constant 0 : index
    %c0_13 = arith.constant 0 : index
    %17 = vector.load %arg2[%c0_12, %c0_13] : memref<8x4xf32, #tpu.memory_space<vmem>>, vector<8x4xf32>
    %18 = arith.truncf %17 : vector<8x4xf32> to vector<8x4xbf16>
    %c0_14 = arith.constant 0 : index
    %c0_15 = arith.constant 0 : index
    %19 = vector.load %arg12[%c0_14, %c0_15] : memref<8x512xbf16, #tpu.memory_space<vmem>>, vector<8x4xbf16>
    tpu.vector_store %arg12[%c0_14, %c0_15], %18 {strides = array<i32>} : memref<8x512xbf16, #tpu.memory_space<vmem>>, vector<8x4xbf16>,
    %c0_16 = arith.constant 0 : index
    %c0_17 = arith.constant 0 : index
    %20 = vector.load %arg12[%c0_16, %c0_17] : memref<8x512xbf16, #tpu.memory_space<vmem>>, vector<8x512xbf16>
    %c0_18 = arith.constant 0 : index
    %c0_19 = arith.constant 0 : index
    %21 = vector.load %arg7[%c0_18, %c0_19] : memref<512x256xbf16, #tpu.memory_space<vmem>>, vector<512x256xbf16>
    %cst_20 = arith.constant dense<0.000000e+00> : vector<8x256xf32>
    %22 = tpu.matmul %20, %21, %cst_20 {dimension_numbers = #tpu.dot_dimension_numbers<[1], [0], [0], [1], [0, 0, 1, 1], [], []>} : vector<8x512xbf16>, vector<512x256xbf16>, vector<8x256xf32> -> vector<8x256xf32>
    %c0_21 = arith.constant 0 : index
    %c0_22 = arith.constant 0 : index
    %23 = vector.load %arg8[%c0_21, %c0_22] : memref<1x256xf32, #tpu.memory_space<vmem>>, vector<1x256xf32>
    %24 = vector.broadcast %23 : vector<1x256xf32> to vector<8x256xf32>
    %25 = arith.addf %22, %24 : vector<8x256xf32>
    %26 = math.tanh %25 : vector<8x256xf32>
    %c0_23 = arith.constant 0 : index
    %c0_24 = arith.constant 0 : index
    %27 = vector.load %arg9[%c0_23, %c0_24] : memref<1x256xf32, #tpu.memory_space<vmem>>, vector<1x256xf32>
    %28 = vector.broadcast %27 : vector<1x256xf32> to vector<8x256xf32>
    %29 = arith.mulf %26, %28 : vector<8x256xf32>
    %cst_25 = arith.constant dense<0.000000e+00> : vector<8xf32>
    %30 = vector.multi_reduction <add>, %29, %cst_25 [1] : vector<8x256xf32> to vector<8xf32>
    %31 = vector.shape_cast %30 : vector<8xf32> to vector<8x1xf32>
    %c0_26 = arith.constant 0 : index
    %c0_27 = arith.constant 0 : index
    %32 = vector.load %arg10[%c0_26, %c0_27] : memref<1x1xf32, #tpu.memory_space<vmem>>, vector<1x1xf32>
    %33 = vector.broadcast %32 : vector<1x1xf32> to vector<8x1xf32>
    %34 = arith.addf %31, %33 : vector<8x1xf32>
    %35 = math.tanh %34 : vector<8x1xf32>
    %c0_28 = arith.constant 0 : index
    %c0_29 = arith.constant 0 : index
    %36 = vector.load %arg11[%c0_28, %c0_29] : memref<8x1xf32, #tpu.memory_space<vmem>>, vector<8x1xf32>
    tpu.vector_store %arg11[%c0_28, %c0_29], %35 {strides = array<i32>} : memref<8x1xf32, #tpu.memory_space<vmem>>, vector<8x1xf32>,
    return
  }
  func.func @transform_0(%arg0: i32) -> (i32, i32) {
    %c0_i32 = arith.constant 0 : i32
    %c0_i32_0 = arith.constant 0 : i32
    return %arg0, %c0_i32 : i32, i32
  }
  func.func @transform_1(%arg0: i32) -> (i32, i32) {
    %c0_i32 = arith.constant 0 : i32
    %c0_i32_0 = arith.constant 0 : i32
    return %arg0, %c0_i32 : i32, i32
  }
  func.func @transform_2(%arg0: i32) -> (i32, i32) {
    %c0_i32 = arith.constant 0 : i32
    %c0_i32_0 = arith.constant 0 : i32
    %c0_i32_1 = arith.constant 0 : i32
    return %c0_i32, %c0_i32_0 : i32, i32
  }
  func.func @transform_3(%arg0: i32) -> (i32, i32) {
    %c0_i32 = arith.constant 0 : i32
    %c0_i32_0 = arith.constant 0 : i32
    %c0_i32_1 = arith.constant 0 : i32
    return %c0_i32, %c0_i32_0 : i32, i32
  }
  func.func @transform_4(%arg0: i32) -> (i32, i32) {
    %c0_i32 = arith.constant 0 : i32
    %c0_i32_0 = arith.constant 0 : i32
    %c0_i32_1 = arith.constant 0 : i32
    return %c0_i32, %c0_i32_0 : i32, i32
  }
  func.func @transform_5(%arg0: i32) -> (i32, i32) {
    %c0_i32 = arith.constant 0 : i32
    %c0_i32_0 = arith.constant 0 : i32
    %c0_i32_1 = arith.constant 0 : i32
    return %c0_i32, %c0_i32_0 : i32, i32
  }
  func.func @transform_6(%arg0: i32) -> (i32, i32) {
    %c0_i32 = arith.constant 0 : i32
    %c0_i32_0 = arith.constant 0 : i32
    %c0_i32_1 = arith.constant 0 : i32
    return %c0_i32, %c0_i32_0 : i32, i32
  }
  func.func @transform_7(%arg0: i32) -> (i32, i32) {
    %c0_i32 = arith.constant 0 : i32
    %c0_i32_0 = arith.constant 0 : i32
    %c0_i32_1 = arith.constant 0 : i32
    return %c0_i32, %c0_i32_0 : i32, i32
  }
  func.func @transform_8(%arg0: i32) -> (i32, i32) {
    %c0_i32 = arith.constant 0 : i32
    %c0_i32_0 = arith.constant 0 : i32
    %c0_i32_1 = arith.constant 0 : i32
    return %c0_i32, %c0_i32_0 : i32, i32
  }
  func.func @transform_9(%arg0: i32) -> (i32, i32) {
    %c0_i32 = arith.constant 0 : i32
    %c0_i32_0 = arith.constant 0 : i32
    %c0_i32_1 = arith.constant 0 : i32
    return %c0_i32, %c0_i32_0 : i32, i32
  }
  func.func @transform_10(%arg0: i32) -> (i32, i32) {
    %c0_i32 = arith.constant 0 : i32
    %c0_i32_0 = arith.constant 0 : i32
    return %arg0, %c0_i32 : i32, i32
  }
}

</mosaic_0001>

<bundles_post_ra>
// kernel: tpu_custom_call.1
= control target key start
LH: loop header
LB: loop body
LE: loop exit
PB: predicated region body
PF: predicated region fallthrough
CT: control target
= control target key end

     0   :  { %s2953_s0 = inlined_call_operand.vmem [shape: f32[8,32], index: 0, kind: input, shape index: {}]   ;;  %s2954_s1 = inlined_call_operand.vmem [shape: f32[8,4], index: 1, kind: input, shape index: {}]   ;;  %s2955_s2 = inlined_call_operand.hbm [shape: bf16[32,640], index: 2, kind: input, shape index: {}]   ;;  %s2956_s3 = inlined_call_operand.vmem [shape: f32[1,640], index: 3, kind: input, shape index: {}]   ;;  %s2957_s4 = inlined_call_operand.hbm [shape: bf16[640,512], index: 4, kind: input, shape index: {}]   ;;  %s2958_s5 = inlined_call_operand.vmem [shape: f32[1,512], index: 5, kind: input, shape index: {}]   ;;  %s2959_s6 = inlined_call_operand.hbm [shape: bf16[512,256], index: 6, kind: input, shape index: {}]   ;;  %s2960_s7 = inlined_call_operand.vmem [shape: f32[1,256], index: 7, kind: input, shape index: {}]   ;;  %s2961_s8 = inlined_call_operand.vmem [shape: f32[1,256], index: 8, kind: input, shape index: {}]   ;;  %s2962_s9 = inlined_call_operand.<no memory space> [shape: f32[1,1], index: 9, kind: input, shape index: {}]   ;;  %s2963_s10 = inlined_call_operand.vmem [shape: f32[8,1], index: 10, kind: output, shape index: {}]  }
   0x1   :  { %v15_v0 = vstv %s2962_s9 }
   0x2   :  { %16 = vst [vmem:[#allocation3] sm:$0x1] %v15_v0 }
   0x3   :  { %17 = vsyncpa [#allocation5], 0 }
   0x4   :  { %18 = vsyncpa [#allocation7], 0  ;;  %s2803_s15 = smov [#allocation6]  }
   0x5   :  { %s42_s16 = sshll.u32 %s2803_s15, 4  ;;  %s43_s16 = int_to_ptr.vmem [resolvable:$true] %s42_s16 }
   0x6   :  { %s2747_s17 = scalar_lea.vmem %s43_s16, 20480  ;;  %p2752_p1 = scmp.lt.s32.totalorder %s43_s16, %s43_s16 }
   0x7   :  { %p2748_p0 = scmp.ne.s32.totalorder %s43_s16, %s2747_s17  ;;  %p2753_p2 = scmp.lt.s32.totalorder %s2747_s17, %s2747_s17 }
   0x9   :  { %p2754_p3 = por %p2753_p2, %p2752_p1 }
   0xb   :  { %p2755_p4 = pnand %p2754_p3, %p2748_p0 }
   0xd   :  { %2758 = shalt.err (!%p2755_p4)
}
   0xe   :  { %s2804_s18 = smov 256   ;;  %s2805_s19 = smov 16  }
   0xf   :  { %48 = dma.hbm_to_vmem [thread:$0]  %s2957_s4, 20480, %s43_s16, [#allocation7], %s2804_s18, %s2804_s18, %s2805_s19  }
  0x10   :  { %s2806_s9 = smov [#allocation4]  }
  0x11   :  { %s28_s22 = sshll.u32 %s2806_s9, 4  ;;  %s29_s22 = int_to_ptr.vmem [resolvable:$true] %s28_s22 }
  0x12   :  { %s2767_s23 = scalar_lea.vmem %s29_s22, 1280  ;;  %p2772_p6 = scmp.lt.s32.totalorder %s29_s22, %s29_s22 }
  0x13   :  { %p2768_p5 = scmp.ne.s32.totalorder %s29_s22, %s2767_s23  ;;  %p2773_p7 = scmp.lt.s32.totalorder %s2767_s23, %s2767_s23 }
  0x15   :  { %p2774_p8 = por %p2773_p7, %p2772_p6 }
  0x17   :  { %p2775_p9 = pnand %p2774_p8, %p2768_p5 }
  0x19   :  { %2778 = shalt.err (!%p2775_p9)
}
  0x1a   :  { %s2807_s24 = smov 320   ;;  %s2808_s25 = smov 20  }
  0x1b   :  { %34 = dma.hbm_to_vmem [thread:$0]  %s2955_s2, 1280, %s29_s22, [#allocation5], %s2807_s24, %s2807_s24, %s2808_s25  }
  0x1c   :  { %s2809_s28 = smov [#allocation8]  }
  0x1d   :  { %s56_s29 = sshll.u32 %s2809_s28, 4  ;;  %s57_s29 = int_to_ptr.vmem [resolvable:$true] %s56_s29 }
  0x1e   :  { %s2787_s4 = scalar_lea.vmem %s57_s29, 8192  ;;  %p2792_p11 = scmp.lt.s32.totalorder %s57_s29, %s57_s29 }
  0x1f   :  { %p2788_p10 = scmp.ne.s32.totalorder %s57_s29, %s2787_s4  ;;  %p2793_p12 = scmp.lt.s32.totalorder %s2787_s4, %s2787_s4 }
  0x21   :  { %p2794_p13 = por %p2793_p12, %p2792_p11 }
  0x23   :  { %p2795_p0 = pnand %p2794_p13, %p2788_p10 }
  0x25   :  { %2798 = shalt.err (!%p2795_p0)
}
  0x26   :  { %s2810_s30 = smov 128   ;;  %s2811_s11 = smov 8  }
  0x27   :  { %62 = dma.hbm_to_vmem [thread:$0]  %s2959_s6, 8192, %s57_s29, [#allocation7], %s2810_s30, %s2810_s30, %s2811_s11  }
  0x28   :  { %2799 = dma.done.wait [#allocation5], 1280  }
  0x29   :  { %2800 = vsyncadd [#allocation5], 4294966016 }
  0x2a   :  { %2801 = dma.done.wait [#allocation7], 28672  }
  0x2b   :  { %2802 = vsyncadd [#allocation7], 4294938624  ;;  %v2812_v1 = vmov 0   ;;  %v2361_v2 = vld [vmem:[#allocation4 + $0x2c] ss:$20 sps:$4 sm:$0xff]   ;;  %vm172_vm0 = vcmask 261120  }
  0x2c   :  { %208 = vmatprep.mubr.bf16.mxu0 %v2812_v1  ;;  %249 = vmatprep.mubr.bf16.mxu1 %v2812_v1  ;;  %v2363_v3 = vld [vmem:[#allocation4 + $0x34] ss:$20 sps:$4 sm:$0xff]   ;;  %v2366_v5 = vld [vmem:[#allocation4 + $0x30] ss:$20 sps:$4 sm:$0xff]   ;;  %v2369_v7 = vld [vmem:[#allocation4 + $0xc] ss:$20 sps:$4 sm:$0xff]  }
  0x2d   :  { %188 = vmatprep.subr.bf16.mxu0 %v2361_v2  ;;  %v2365_v4 = vld [vmem:[#allocation4 + $0x28] ss:$20 sps:$4 sm:$0xff]   ;;  %229 = vmatprep.subr.bf16.mxu1 %v2363_v3  ;;  %v2367_v6 = vld [vmem:[#allocation4 + $0x4] ss:$20 sps:$4 sm:$0xff]   ;;  %v2371_v8 = vld [vmem:[#allocation4] ss:$20 sps:$4 sm:$0xff]  }
  0x2e   :  { %189 = vmatpush1.bf16.msra.mxu0 %v2365_v4  ;;  %230 = vmatpush1.bf16.msra.mxu1 %v2366_v5  ;;  %v2372_v9 = vld [vmem:[#allocation4 + $0x8] ss:$20 sps:$4 sm:$0xff]   ;;  %v79_v10 = vld [vmem:[%s2953_s0] sm:$0xff]  ;;  %v2813_v14 = vmov 0.0   ;;  %vm2814_vm1 = vmmov 0   ;;  %vm1560_vm2 = vcmask 27648  }
  0x2f   :  { %190 = vmatprep.subr.bf16.mxu0 %v2367_v6  ;;  %231 = vmatprep.subr.bf16.mxu1 %v2369_v7  ;;  %v80_v11 = vpack.c.bf16 %v79_v10, %v79_v10  ;;  %v2373_v12 = vld [vmem:[#allocation4 + $0x38] ss:$20 sps:$4 sm:$0xff]   ;;  %v2377_v13 = vld [vmem:[#allocation6 + $0xe4] ss:$16 sps:$4 sm:$0xff]   ;;  %v2375_v15 = vld [vmem:[#allocation6 + $0xe0] ss:$16 sps:$4 sm:$0xff]  }
  0x30   :  { %v2383_v16 = vld [vmem:[#allocation6 + $0xc4] ss:$16 sps:$4 sm:$0xff]   ;;  %v2381_v19 = vld [vmem:[#allocation6 + $0xc0] ss:$16 sps:$4 sm:$0xff]   ;;  %vm2084_vm3 = vcmask 7168  }
  0x31   :  { %v2374_v17 = vld [vmem:[#allocation4 + $0x10] ss:$20 sps:$4 sm:$0xff]  }
  0x32   :  { %191 = vmatpush1.bf16.msra.mxu0 %v2371_v8  ;;  %232 = vmatpush1.bf16.msra.mxu1 %v2372_v9  ;;  %v2380_v18 = vld [vmem:[#allocation6 + $0x2e4] ss:$16 sps:$4 sm:$0xff]   ;;  %v2378_v21 = vld [vmem:[#allocation6 + $0x2e0] ss:$16 sps:$4 sm:$0xff]  }
  0x33   :  { %2341 = vmatprep.subr.bf16.mxu0 %v2813_v14  ;;  %1290 = vmatprep.subr.bf16.mxu1 %v2377_v13  ;;  %v2389_v20 = vld [vmem:[#allocation6 + $0xa4] ss:$16 sps:$4 sm:$0xff]   ;;  %v2387_v23 = vld [vmem:[#allocation6 + $0xa0] ss:$16 sps:$4 sm:$0xff]  }
  0x34   :  { %v2386_v22 = vld [vmem:[#allocation6 + $0x2c4] ss:$16 sps:$4 sm:$0xff]   ;;  %v2384_v25 = vld [vmem:[#allocation6 + $0x2c0] ss:$16 sps:$4 sm:$0xff]  }
  0x35   :  { %2102 = vmatmul.mubr.msk.bf16.vlgmr.msra.gmra.mxu0 %vm172_vm0, %v80_v11  ;;  %2103 = vmatmul.mubr.msk.bf16.vlgmr.msra.gmra.mxu1 %vm172_vm0, %v80_v11  ;;  %v2395_v24 = vld [vmem:[#allocation6 + $0x84] ss:$16 sps:$4 sm:$0xff]   ;;  %v2393_v27 = vld [vmem:[#allocation6 + $0x80] ss:$16 sps:$4 sm:$0xff]  }
  0x36   :  { %2342 = vmatpush3.bf16.msra.mxu0 %v2373_v12  ;;  %2345 = vmatprep.mubr.msk.bf16.mxu0 %vm2814_vm1, %v2813_v14  ;;  %v2392_v26 = vld [vmem:[#allocation6 + $0x2a4] ss:$16 sps:$4 sm:$0xff]   ;;  %v2390_v29 = vld [vmem:[#allocation6 + $0x2a0] ss:$16 sps:$4 sm:$0xff]  }
  0x37   :  { %2343 = vmatprep.subr.bf16.mxu0 %v2813_v14  ;;  %1291 = vmatpush1.bf16.msra.mxu1 %v2375_v15  ;;  %v2401_v28 = vld [vmem:[#allocation6 + $0x64] ss:$16 sps:$4 sm:$0xff]   ;;  %v2399_v31 = vld [vmem:[#allocation6 + $0x60] ss:$16 sps:$4 sm:$0xff]  }
  0x38   :  { %1292 = vmatprep.subr.bf16.mxu1 %v2383_v16  ;;  %v2398_v30 = vld [vmem:[#allocation6 + $0x284] ss:$16 sps:$4 sm:$0xff]   ;;  %v2396_v33 = vld [vmem:[#allocation6 + $0x280] ss:$16 sps:$4 sm:$0xff]  }
  0x39   :  { %v2407_v32 = vld [vmem:[#allocation6 + $0x44] ss:$16 sps:$4 sm:$0xff]   ;;  %v2405_v35 = vld [vmem:[#allocation6 + $0x40] ss:$16 sps:$4 sm:$0xff]  }
  0x3a   :  { %2344 = vmatpush3.bf16.msra.mxu0 %v2374_v17  ;;  %v2404_v34 = vld [vmem:[#allocation6 + $0x264] ss:$16 sps:$4 sm:$0xff]   ;;  %v2402_v37 = vld [vmem:[#allocation6 + $0x260] ss:$16 sps:$4 sm:$0xff]   ;;  %v2476_v17 = vld [vmem:[#allocation6 + $0xec] ss:$16 sps:$4 sm:$0xff]  }
  0x3b   :  { %1331 = vmatprep.subr.bf16.mxu0 %v2380_v18  ;;  %1293 = vmatpush1.bf16.msra.mxu1 %v2381_v19  ;;  %v2413_v36 = vld [vmem:[#allocation6 + $0x24] ss:$16 sps:$4 sm:$0xff]   ;;  %v2411_v39 = vld [vmem:[#allocation6 + $0x20] ss:$16 sps:$4 sm:$0xff]   ;;  %v95_v18 = vlaneseq }
  0x3c   :  { %1294 = vmatprep.subr.bf16.mxu1 %v2389_v20  ;;  %v2410_v38 = vld [vmem:[#allocation6 + $0x244] ss:$16 sps:$4 sm:$0xff]   ;;  %v2408_v41 = vld [vmem:[#allocation6 + $0x240] ss:$16 sps:$4 sm:$0xff]  }
  0x3d   :  { %2346 = vmatmul.mubr.msk.bf16.vlgmr.msra.gmra.mxu0 %vm172_vm0, %v80_v11  ;;  %v2419_v40 = vld [vmem:[#allocation6 + $0x4] ss:$16 sps:$4 sm:$0xff]   ;;  %v2417_v43 = vld [vmem:[#allocation6] ss:$16 sps:$4 sm:$0xff]   ;;  %v2890_v19 = vshrl.u32 %v95_v18, 7 }
  0x3e   :  { %1332 = vmatpush1.bf16.msra.mxu0 %v2378_v21  ;;  %v2416_v42 = vld [vmem:[#allocation6 + $0x224] ss:$16 sps:$4 sm:$0xff]   ;;  %v2414_v45 = vld [vmem:[#allocation6 + $0x220] ss:$16 sps:$4 sm:$0xff]   ;;  %v2510_v18 = vld [vmem:[#allocation6 + $0x28] ss:$16 sps:$4 sm:$0xff]  }
  0x3f   :  { %1333 = vmatprep.subr.bf16.mxu0 %v2386_v22  ;;  %1295 = vmatpush1.bf16.msra.mxu1 %v2387_v23  ;;  %v2425_v44 = vld [vmem:[#allocation6 + $0x1e4] ss:$16 sps:$4 sm:$0xff]   ;;  %v2423_v47 = vld [vmem:[#allocation6 + $0x1e0] ss:$16 sps:$4 sm:$0xff]   ;;  %v2893_v20 = vsub.s32 0, %v2890_v19  ;;  %v105_v21 = vsub.s32 2, %v2890_v19 }
  0x40   :  { %1296 = vmatprep.subr.bf16.mxu1 %v2395_v24  ;;  %v2422_v46 = vld [vmem:[#allocation6 + $0x204] ss:$16 sps:$4 sm:$0xff]   ;;  %v2420_v49 = vld [vmem:[#allocation6 + $0x200] ss:$16 sps:$4 sm:$0xff]   ;;  %v2900_v23 = vsub.s32 1, %v2890_v19  ;;  %v109_v24 = vsub.s32 3, %v2890_v19 }
  0x41   :  { %v2431_v48 = vld [vmem:[#allocation6 + $0x1c4] ss:$16 sps:$4 sm:$0xff]   ;;  %v2429_v51 = vld [vmem:[#allocation6 + $0x1c0] ss:$16 sps:$4 sm:$0xff]  }
  0x42   :  { %1334 = vmatpush1.bf16.msra.mxu0 %v2384_v25  ;;  %v2428_v50 = vld [vmem:[#allocation6 + $0x3e4] ss:$16 sps:$4 sm:$0xff]   ;;  %v2426_v53 = vld [vmem:[#allocation6 + $0x3e0] ss:$16 sps:$4 sm:$0xff]  }
  0x43   :  { %1335 = vmatprep.subr.bf16.mxu0 %v2392_v26  ;;  %1297 = vmatpush1.bf16.msra.mxu1 %v2393_v27  ;;  %v2437_v52 = vld [vmem:[#allocation6 + $0x1a4] ss:$16 sps:$4 sm:$0xff]   ;;  %v2435_v55 = vld [vmem:[#allocation6 + $0x1a0] ss:$16 sps:$4 sm:$0xff]  }
  0x44   :  { %1298 = vmatprep.subr.bf16.mxu1 %v2401_v28  ;;  %v2434_v54 = vld [vmem:[#allocation6 + $0x3c4] ss:$16 sps:$4 sm:$0xff]   ;;  %v2432_v56 = vld [vmem:[#allocation6 + $0x3c0] ss:$16 sps:$4 sm:$0xff]  }
  0x45   :  { %v2440_v57 = vld [vmem:[#allocation6 + $0x3a4] ss:$16 sps:$4 sm:$0xff]   ;;  %v2438_v58 = vld [vmem:[#allocation6 + $0x3a0] ss:$16 sps:$4 sm:$0xff]  }
  0x46   :  { %1336 = vmatpush1.bf16.msra.mxu0 %v2390_v29  ;;  %v2443_v59 = vld [vmem:[#allocation6 + $0x184] ss:$16 sps:$4 sm:$0xff]   ;;  %v2441_v61 = vld [vmem:[#allocation6 + $0x180] ss:$16 sps:$4 sm:$0xff]  }
  0x47   :  { %1337 = vmatprep.subr.bf16.mxu0 %v2398_v30  ;;  %1299 = vmatpush1.bf16.msra.mxu1 %v2399_v31  ;;  %v2446_v60 = vld [vmem:[#allocation6 + $0x384] ss:$16 sps:$4 sm:$0xff]   ;;  %v2444_v62 = vld [vmem:[#allocation6 + $0x380] ss:$16 sps:$4 sm:$0xff]  }
  0x48   :  { %1300 = vmatprep.subr.bf16.mxu1 %v2407_v32  ;;  %v2449_v63 = vld [vmem:[#allocation6 + $0x164] ss:$16 sps:$4 sm:$0xff]   ;;  %v2447_v2 = vld [vmem:[#allocation6 + $0x160] ss:$16 sps:$4 sm:$0xff]  }
  0x49   :  { %v2452_v0 = vld [vmem:[#allocation6 + $0x364] ss:$16 sps:$4 sm:$0xff]   ;;  %v2450_v3 = vld [vmem:[#allocation6 + $0x360] ss:$16 sps:$4 sm:$0xff]  }
  0x4a   :  { %1338 = vmatpush1.bf16.msra.mxu0 %v2396_v33  ;;  %v2455_v4 = vld [vmem:[#allocation6 + $0x144] ss:$16 sps:$4 sm:$0xff]   ;;  %v2453_v6 = vld [vmem:[#allocation6 + $0x140] ss:$16 sps:$4 sm:$0xff]  }
  0x4b   :  { %1339 = vmatprep.subr.bf16.mxu0 %v2404_v34  ;;  %1301 = vmatpush1.bf16.msra.mxu1 %v2405_v35  ;;  %v2458_v5 = vld [vmem:[#allocation6 + $0x344] ss:$16 sps:$4 sm:$0xff]   ;;  %v2456_v7 = vld [vmem:[#allocation6 + $0x340] ss:$16 sps:$4 sm:$0xff]  }
  0x4c   :  { %1302 = vmatprep.subr.bf16.mxu1 %v2413_v36  ;;  %v2461_v8 = vld [vmem:[#allocation6 + $0x124] ss:$16 sps:$4 sm:$0xff]   ;;  %v2459_v10 = vld [vmem:[#allocation6 + $0x120] ss:$16 sps:$4 sm:$0xff]  }
  0x4d   :  { %v2464_v9 = vld [vmem:[#allocation6 + $0x324] ss:$16 sps:$4 sm:$0xff]   ;;  %v2462_v11 = vld [vmem:[#allocation6 + $0x320] ss:$16 sps:$4 sm:$0xff]  }
  0x4e   :  { %1340 = vmatpush1.bf16.msra.mxu0 %v2402_v37  ;;  %v2467_v12 = vld [vmem:[#allocation6 + $0x104] ss:$16 sps:$4 sm:$0xff]   ;;  %v2465_v14 = vld [vmem:[#allocation6 + $0x100] ss:$16 sps:$4 sm:$0xff]  }
  0x4f   :  { %1341 = vmatprep.subr.bf16.mxu0 %v2410_v38  ;;  %1303 = vmatpush1.bf16.msra.mxu1 %v2411_v39  ;;  %v2470_v13 = vld [vmem:[#allocation6 + $0x304] ss:$16 sps:$4 sm:$0xff]   ;;  %v2468_v15 = vld [vmem:[#allocation6 + $0x300] ss:$16 sps:$4 sm:$0xff]  }
  0x50   :  { %1304 = vmatprep.subr.bf16.mxu1 %v2419_v40  ;;  %v2473_v16 = vld [vmem:[#allocation6 + $0x4e4] ss:$16 sps:$4 sm:$0xff]   ;;  %v93_v22 = vld [vmem:[%s2956_s3] sm:$0x1f] }
  0x51   :  { %v98_v25 = vrot.slane %v93_v22, %v2893_v20  ;;  %v106_v26 = vrot.slane %v93_v22, %v105_v21  ;;  %v102_v27 = vrot.slane %v93_v22, %v2900_v23  ;;  %v110_v28 = vrot.slane %v93_v22, %v109_v24 }
  0x52   :  { %1342 = vmatpush1.bf16.msra.mxu0 %v2408_v41 }
  0x53   :  { %1343 = vmatprep.subr.bf16.mxu0 %v2416_v42  ;;  %1305 = vmatpush1.bf16.msra.mxu1 %v2417_v43 }
  0x54   :  { %1306 = vmatprep.subr.bf16.mxu1 %v2425_v44 }
  0x56   :  { %1344 = vmatpush1.bf16.msra.mxu0 %v2414_v45 }
  0x57   :  { %1345 = vmatprep.subr.bf16.mxu0 %v2422_v46  ;;  %1307 = vmatpush2.bf16.msra.mxu1 %v2423_v47 }
  0x58   :  { %1308 = vmatprep.subr.bf16.mxu1 %v2431_v48 }
  0x5a   :  { %1346 = vmatpush1.bf16.msra.mxu0 %v2420_v49 }
  0x5b   :  { %1347 = vmatprep.subr.bf16.mxu0 %v2428_v50  ;;  %1309 = vmatpush2.bf16.msra.mxu1 %v2429_v51  ;;  %v2471_v51 = vld [vmem:[#allocation6 + $0x4e0] ss:$16 sps:$4 sm:$0xff]  }
  0x5c   :  { %1310 = vmatprep.subr.bf16.mxu1 %v2437_v52 }
  0x5e   :  { %1348 = vmatpush2.bf16.msra.mxu0 %v2426_v53 }
  0x5f   :  { %1349 = vmatprep.subr.bf16.mxu0 %v2434_v54  ;;  %1311 = vmatpush2.bf16.msra.mxu1 %v2435_v55  ;;  %v2474_v54 = vld [vmem:[#allocation6 + $0xe8] ss:$16 sps:$4 sm:$0xff]   ;;  %v2479_v55 = vld [vmem:[#allocation6 + $0x4c4] ss:$16 sps:$4 sm:$0xff]  }
  0x60   :  { %1312 = vmatprep.subr.bf16.mxu1 %v2443_v59  ;;  %v2480_v59 = vld [vmem:[#allocation6 + $0xc8] ss:$16 sps:$4 sm:$0xff]  }
  0x62   :  { %1350 = vmatpush2.bf16.msra.mxu0 %v2432_v56  ;;  %v2482_v56 = vld [vmem:[#allocation6 + $0xcc] ss:$16 sps:$4 sm:$0xff]  }
  0x63   :  { %1351 = vmatprep.subr.bf16.mxu0 %v2440_v57  ;;  %1313 = vmatpush2.bf16.msra.mxu1 %v2441_v61  ;;  %v113_v57 = vsub.s32 4, %v2890_v19  ;;  %v2488_v61 = vld [vmem:[#allocation6 + $0xac] ss:$16 sps:$4 sm:$0xff]  }
  0x64   :  { %1314 = vmatprep.subr.bf16.mxu1 %v2449_v63  ;;  %v2483_v63 = vld [vmem:[#allocation6 + $0x4a0] ss:$16 sps:$4 sm:$0xff]  }
  0x66   :  { %1352 = vmatpush2.bf16.msra.mxu0 %v2438_v58  ;;  %v2477_v58 = vld [vmem:[#allocation6 + $0x4c0] ss:$16 sps:$4 sm:$0xff]  }
  0x67   :  { %1353 = vmatprep.subr.bf16.mxu0 %v2446_v60  ;;  %1315 = vmatpush2.bf16.msra.mxu1 %v2447_v2  ;;  %v2485_v60 = vld [vmem:[#allocation6 + $0x4a4] ss:$16 sps:$4 sm:$0xff]  }
  0x68   :  { %1316 = vmatprep.subr.bf16.mxu1 %v2455_v4  ;;  %v2491_v2 = vld [vmem:[#allocation6 + $0x484] ss:$16 sps:$4 sm:$0xff]  }
  0x6a   :  { %1354 = vmatpush2.bf16.msra.mxu0 %v2444_v62  ;;  %v114_v62 = vrot.slane %v93_v22, %v113_v57  ;;  %v2515_v22 = vld [vmem:[#allocation6 + $0x404] ss:$16 sps:$4 sm:$0xff]   ;;  %v2557_v57 = vld [vmem:[#allocation6 + $0x12c] ss:$16 sps:$4 sm:$0xff]  }
  0x6b   :  { %1355 = vmatprep.subr.bf16.mxu0 %v2452_v0  ;;  %1317 = vmatpush2.bf16.msra.mxu1 %v2453_v6  ;;  %v2486_v0 = vld [vmem:[#allocation6 + $0xa8] ss:$16 sps:$4 sm:$0xff]  }
  0x6c   :  { %1318 = vmatprep.subr.bf16.mxu1 %v2461_v8  ;;  %v2492_v6 = vld [vmem:[#allocation6 + $0x88] ss:$16 sps:$4 sm:$0xff]   ;;  %v2500_v8 = vld [vmem:[#allocation6 + $0x6c] ss:$16 sps:$4 sm:$0xff]  }
  0x6e   :  { %1356 = vmatpush2.bf16.msra.mxu0 %v2450_v3  ;;  %v2494_v3 = vld [vmem:[#allocation6 + $0x8c] ss:$16 sps:$4 sm:$0xff]  }
  0x6f   :  { %1357 = vmatprep.subr.bf16.mxu0 %v2458_v5  ;;  %1319 = vmatpush2.bf16.msra.mxu1 %v2459_v10  ;;  %v2489_v5 = vld [vmem:[#allocation6 + $0x480] ss:$16 sps:$4 sm:$0xff]   ;;  %v2498_v10 = vld [vmem:[#allocation6 + $0x68] ss:$16 sps:$4 sm:$0xff]  }
  0x70   :  { %1320 = vmatprep.subr.bf16.mxu1 %v2467_v12  ;;  %v2506_v12 = vld [vmem:[#allocation6 + $0x4c] ss:$16 sps:$4 sm:$0xff]  }
  0x72   :  { %1358 = vmatpush2.bf16.msra.mxu0 %v2456_v7  ;;  %v2497_v7 = vld [vmem:[#allocation6 + $0x464] ss:$16 sps:$4 sm:$0xff]  }
  0x73   :  { %1359 = vmatprep.subr.bf16.mxu0 %v2464_v9  ;;  %1321 = vmatpush2.bf16.msra.mxu1 %v2465_v14  ;;  %v2495_v9 = vld [vmem:[#allocation6 + $0x460] ss:$16 sps:$4 sm:$0xff]   ;;  %v2504_v14 = vld [vmem:[#allocation6 + $0x48] ss:$16 sps:$4 sm:$0xff]  }
  0x74   :  { %1372 = vmatprep.subr.bf16.mxu1 %v2473_v16  ;;  %v2512_v16 = vld [vmem:[#allocation6 + $0x2c] ss:$16 sps:$4 sm:$0xff]  }
  0x76   :  { %1360 = vmatpush2.bf16.msra.mxu0 %v2462_v11  ;;  %v2503_v11 = vld [vmem:[#allocation6 + $0x444] ss:$16 sps:$4 sm:$0xff]  }
  0x77   :  { %1361 = vmatprep.subr.bf16.mxu0 %v2470_v13  ;;  %v2501_v13 = vld [vmem:[#allocation6 + $0x440] ss:$16 sps:$4 sm:$0xff]  }
  0x7a   :  { %1362 = vmatpush2.bf16.msra.mxu0 %v2468_v15  ;;  %v2509_v15 = vld [vmem:[#allocation6 + $0x424] ss:$16 sps:$4 sm:$0xff]  }
  0x7b   :  { %1413 = vmatprep.subr.bf16.mxu0 %v2476_v17  ;;  %v2507_v17 = vld [vmem:[#allocation6 + $0x420] ss:$16 sps:$4 sm:$0xff]  }
  0xf5   :  { %v210_v29 = vpop.f32.mrf.mxu0  ;;  %v251_v30 = vpop.f32.mrf.mxu1 }
  0xf6   :  { %v211_v31 = vadd.f32 %v210_v29, %v98_v25  ;;  %v252_v32 = vadd.f32 %v251_v30, %v106_v26  ;;  %v2518_v25 = vld [vmem:[#allocation6 + $0xc] ss:$16 sps:$4 sm:$0xff]  }
  0xf7   :  { %v212_v33 = vpop.f32.mrf.mxu0  ;;  %v253_v34 = vpop.f32.mrf.mxu1  ;;  %v2524_v29 = vld [vmem:[#allocation6 + $0x2ec] ss:$16 sps:$4 sm:$0xff]  }
  0xf8   :  { %2713 = vtanh.f32 %v211_v31  ;;  %v213_v35 = vadd.f32 %v212_v33, %v102_v27  ;;  %v254_v36 = vadd.f32 %v253_v34, %v110_v28  ;;  %v2513_v27 = vld [vmem:[#allocation6 + $0x400] ss:$16 sps:$4 sm:$0xff]   ;;  %v2516_v28 = vld [vmem:[#allocation6 + $0x8] ss:$16 sps:$4 sm:$0xff]   ;;  %v2521_v30 = vld [vmem:[#allocation6 + $0x1ec] ss:$16 sps:$4 sm:$0xff]  }
  0xf9   :  { %2715 = vtanh.f32 %v252_v32  ;;  %v214_v37 = vpop.f32.mrf.mxu0  ;;  %v255_v38 = vpop.f32.mrf.mxu1  ;;  %v2522_v32 = vld [vmem:[#allocation6 + $0x2e8] ss:$16 sps:$4 sm:$0xff]   ;;  %v2530_v34 = vld [vmem:[#allocation6 + $0x2cc] ss:$16 sps:$4 sm:$0xff]  }
  0xfa   :  { %2717 = vtanh.f32 %v213_v35  ;;  %v2519_v33 = vld [vmem:[#allocation6 + $0x1e8] ss:$16 sps:$4 sm:$0xff]   ;;  %v2527_v35 = vld [vmem:[#allocation6 + $0x1cc] ss:$16 sps:$4 sm:$0xff]  }
  0xfb   :  { %2719 = vtanh.f32 %v254_v36  ;;  %v215_v39 = vpop.f32.mrf.mxu0  ;;  %v256_v40 = vpop.f32.mrf.mxu1  ;;  %v2528_v36 = vld [vmem:[#allocation6 + $0x2c8] ss:$16 sps:$4 sm:$0xff]   ;;  %v2536_v38 = vld [vmem:[#allocation6 + $0x2ac] ss:$16 sps:$4 sm:$0xff]  }
  0xfc   :  { %v2525_v37 = vld [vmem:[#allocation6 + $0x1c8] ss:$16 sps:$4 sm:$0xff]   ;;  %v2533_v39 = vld [vmem:[#allocation6 + $0x1ac] ss:$16 sps:$4 sm:$0xff]  }
  0xfd   :  { %v292_v41 = vpop.f32.mrf.mxu0  ;;  %v2534_v40 = vld [vmem:[#allocation6 + $0x2a8] ss:$16 sps:$4 sm:$0xff]  }
  0xfe   :  { %v293_v4 = vadd.f32 %v292_v41, %v114_v62  ;;  %v2531_v41 = vld [vmem:[#allocation6 + $0x1a8] ss:$16 sps:$4 sm:$0xff]  }
  0xff   :  { %v2347_v42 = vpop.f32.mrf.mxu0  ;;  %v2564_v62 = vld [vmem:[#allocation6 + $0x208] ss:$16 sps:$4 sm:$0xff]  }
 0x100   :  { %2721 = vtanh.f32 %v293_v4  ;;  %v2542_v42 = vld [vmem:[#allocation6 + $0x28c] ss:$16 sps:$4 sm:$0xff]   ;;  %v2570_v4 = vld [vmem:[#allocation6 + $0x4e8] ss:$16 sps:$4 sm:$0xff]  }
 0x101   :  { %v295_v43 = vpop.f32.mrf.mxu0 }
 0x102   :  { %v2539_v43 = vld [vmem:[#allocation6 + $0x18c] ss:$16 sps:$4 sm:$0xff]  }
 0x103   :  { %v2348_v44 = vpop.f32.mrf.mxu0 }
 0x104   :  { %v2540_v44 = vld [vmem:[#allocation6 + $0x288] ss:$16 sps:$4 sm:$0xff]  }
 0x105   :  { %v2714_v45 = vpop.eup %2713 }
 0x106   :  { %v2716_v46 = vpop.eup %2715  ;;  %v2911_v52 = vpack.c.bf16 %v2714_v45, %v2714_v45  ;;  %v2537_v45 = vld [vmem:[#allocation6 + $0x188] ss:$16 sps:$4 sm:$0xff]  }
 0x107   :  { %v2718_v47 = vpop.eup %2717  ;;  %v2909_v49 = vpack.c.bf16 %v2716_v46, %v2716_v46  ;;  %v2548_v46 = vld [vmem:[#allocation6 + $0x26c] ss:$16 sps:$4 sm:$0xff]  }
 0x108   :  { %v2720_v48 = vpop.eup %2719  ;;  %v304_v50 = vpack.c.bf16 %v2718_v47, %v2718_v47  ;;  %v2545_v47 = vld [vmem:[#allocation6 + $0x16c] ss:$16 sps:$4 sm:$0xff]  }
 0x109   :  { %v2913_v53 = vpack.c.bf16 %v2720_v48, %v2720_v48  ;;  %v2546_v48 = vld [vmem:[#allocation6 + $0x268] ss:$16 sps:$4 sm:$0xff]  }
 0x10a   :  { %1322 = vmatprep.mubr.bf16.mxu1 %v304_v50 }
 0x10b   :  { %1363 = vmatprep.mubr.bf16.mxu0 %v2913_v53  ;;  %1323 = vmatmul.mubr.bf16.vlgmr.msra.gmra.mxu1 %v2911_v52 }
 0x10c   :  { %1364 = vmatmul.mubr.bf16.vlgmr.msra.gmra.mxu0 %v2909_v49  ;;  %1373 = vmatpush1.bf16.msra.mxu1 %v2471_v51  ;;  %v2554_v51 = vld [vmem:[#allocation6 + $0x24c] ss:$16 sps:$4 sm:$0xff]  }
 0x10d   :  { %1414 = vmatpush1.bf16.msra.mxu0 %v2474_v54  ;;  %1445 = vmatprep.mubr.bf16.mxu0 %v304_v50  ;;  %v2722_v26 = vpop.eup %2721  ;;  %v2543_v50 = vld [vmem:[#allocation6 + $0x168] ss:$16 sps:$4 sm:$0xff]  }
 0x10e   :  { %1374 = vmatprep.subr.bf16.mxu1 %v2479_v55  ;;  %1415 = vmatprep.subr.bf16.mxu0 %v2482_v56  ;;  %v2920_v31 = vpack.c.bf16 %v2722_v26, %v2722_v26  ;;  %v2552_v54 = vld [vmem:[#allocation6 + $0x248] ss:$16 sps:$4 sm:$0xff]   ;;  %v2560_v56 = vld [vmem:[#allocation6 + $0x22c] ss:$16 sps:$4 sm:$0xff]  }
 0x10f   :  { %1404 = vmatprep.mubr.bf16.mxu1 %v2812_v1  ;;  %v2549_v55 = vld [vmem:[#allocation6 + $0x148] ss:$16 sps:$4 sm:$0xff]  }
 0x110   :  { %1375 = vmatpush1.bf16.msra.mxu1 %v2477_v58  ;;  %v2558_v58 = vld [vmem:[#allocation6 + $0x228] ss:$16 sps:$4 sm:$0xff]  }
 0x111   :  { %1416 = vmatpush1.bf16.msra.mxu0 %v2480_v59  ;;  %1376 = vmatprep.subr.bf16.mxu1 %v2485_v60  ;;  %v2555_v59 = vld [vmem:[#allocation6 + $0x128] ss:$16 sps:$4 sm:$0xff]   ;;  %v2566_v60 = vld [vmem:[#allocation6 + $0x20c] ss:$16 sps:$4 sm:$0xff]  }
 0x112   :  { %1417 = vmatprep.subr.bf16.mxu0 %v2488_v61  ;;  %v2563_v61 = vld [vmem:[#allocation6 + $0x10c] ss:$16 sps:$4 sm:$0xff]   ;;  %v2597_v26 = vld [vmem:[#allocation6 + $0x348] ss:$16 sps:$4 sm:$0xff]  }
 0x114   :  { %1377 = vmatpush1.bf16.msra.mxu1 %v2483_v63  ;;  %v2561_v63 = vld [vmem:[#allocation6 + $0x108] ss:$16 sps:$4 sm:$0xff]  }
 0x115   :  { %1418 = vmatpush1.bf16.msra.mxu0 %v2486_v0  ;;  %1378 = vmatprep.subr.bf16.mxu1 %v2491_v2  ;;  %v2569_v0 = vld [vmem:[#allocation6 + $0x3ec] ss:$16 sps:$4 sm:$0xff]  }
 0x116   :  { %1419 = vmatprep.subr.bf16.mxu0 %v2494_v3  ;;  %v2572_v2 = vld [vmem:[#allocation6 + $0x4ec] ss:$16 sps:$4 sm:$0xff]   ;;  %v2567_v3 = vld [vmem:[#allocation6 + $0x3e8] ss:$16 sps:$4 sm:$0xff]  }
 0x118   :  { %1379 = vmatpush1.bf16.msra.mxu1 %v2489_v5  ;;  %v2575_v5 = vld [vmem:[#allocation6 + $0x3cc] ss:$16 sps:$4 sm:$0xff]  }
 0x119   :  { %1420 = vmatpush1.bf16.msra.mxu0 %v2492_v6  ;;  %1380 = vmatprep.subr.bf16.mxu1 %v2497_v7  ;;  %v2578_v6 = vld [vmem:[#allocation6 + $0x4cc] ss:$16 sps:$4 sm:$0xff]   ;;  %v2573_v7 = vld [vmem:[#allocation6 + $0x3c8] ss:$16 sps:$4 sm:$0xff]  }
 0x11a   :  { %1421 = vmatprep.subr.bf16.mxu0 %v2500_v8  ;;  %v2576_v8 = vld [vmem:[#allocation6 + $0x4c8] ss:$16 sps:$4 sm:$0xff]  }
 0x11c   :  { %1381 = vmatpush1.bf16.msra.mxu1 %v2495_v9  ;;  %v2581_v9 = vld [vmem:[#allocation6 + $0x3ac] ss:$16 sps:$4 sm:$0xff]  }
 0x11d   :  { %1422 = vmatpush1.bf16.msra.mxu0 %v2498_v10  ;;  %1382 = vmatprep.subr.bf16.mxu1 %v2503_v11  ;;  %v2584_v10 = vld [vmem:[#allocation6 + $0x4ac] ss:$16 sps:$4 sm:$0xff]   ;;  %v2579_v11 = vld [vmem:[#allocation6 + $0x3a8] ss:$16 sps:$4 sm:$0xff]  }
 0x11e   :  { %1423 = vmatprep.subr.bf16.mxu0 %v2506_v12  ;;  %v2582_v12 = vld [vmem:[#allocation6 + $0x4a8] ss:$16 sps:$4 sm:$0xff]  }
 0x120   :  { %1383 = vmatpush1.bf16.msra.mxu1 %v2501_v13  ;;  %v2587_v13 = vld [vmem:[#allocation6 + $0x38c] ss:$16 sps:$4 sm:$0xff]  }
 0x121   :  { %1424 = vmatpush1.bf16.msra.mxu0 %v2504_v14  ;;  %1384 = vmatprep.subr.bf16.mxu1 %v2509_v15  ;;  %v2590_v14 = vld [vmem:[#allocation6 + $0x48c] ss:$16 sps:$4 sm:$0xff]   ;;  %v2588_v15 = vld [vmem:[#allocation6 + $0x488] ss:$16 sps:$4 sm:$0xff]  }
 0x122   :  { %1425 = vmatprep.subr.bf16.mxu0 %v2512_v16  ;;  %v2593_v16 = vld [vmem:[#allocation6 + $0x36c] ss:$16 sps:$4 sm:$0xff]  }
 0x124   :  { %1385 = vmatpush1.bf16.msra.mxu1 %v2507_v17  ;;  %v2596_v17 = vld [vmem:[#allocation6 + $0x46c] ss:$16 sps:$4 sm:$0xff]  }
 0x125   :  { %1426 = vmatpush1.bf16.msra.mxu0 %v2510_v18  ;;  %1386 = vmatprep.subr.bf16.mxu1 %v2515_v22  ;;  %v2591_v18 = vld [vmem:[#allocation6 + $0x368] ss:$16 sps:$4 sm:$0xff]   ;;  %v2599_v22 = vld [vmem:[#allocation6 + $0x34c] ss:$16 sps:$4 sm:$0xff]  }
 0x126   :  { %1427 = vmatprep.subr.bf16.mxu0 %v2518_v25  ;;  %v2602_v25 = vld [vmem:[#allocation6 + $0x44c] ss:$16 sps:$4 sm:$0xff]  }
 0x128   :  { %1387 = vmatpush1.bf16.msra.mxu1 %v2513_v27  ;;  %v2600_v27 = vld [vmem:[#allocation6 + $0x448] ss:$16 sps:$4 sm:$0xff]  }
 0x129   :  { %1428 = vmatpush1.bf16.msra.mxu0 %v2516_v28  ;;  %1454 = vmatprep.subr.bf16.mxu1 %v2524_v29  ;;  %v2605_v28 = vld [vmem:[#allocation6 + $0x32c] ss:$16 sps:$4 sm:$0xff]  }
 0x12a   :  { %1429 = vmatprep.subr.bf16.mxu0 %v2521_v30  ;;  %v2608_v29 = vld [vmem:[#allocation6 + $0x42c] ss:$16 sps:$4 sm:$0xff]   ;;  %v2603_v30 = vld [vmem:[#allocation6 + $0x328] ss:$16 sps:$4 sm:$0xff]  }
 0x12b   :  { %1405 = vmatmul.mubr.bf16.vlgmr.msra.gmra.mxu1 %v2920_v31 }
 0x12c   :  { %1455 = vmatpush1.bf16.msra.mxu1 %v2522_v32  ;;  %1486 = vmatprep.mubr.bf16.mxu1 %v2913_v53  ;;  %v2551_v53 = vld [vmem:[#allocation6 + $0x14c] ss:$16 sps:$4 sm:$0xff]   ;;  %v2606_v32 = vld [vmem:[#allocation6 + $0x428] ss:$16 sps:$4 sm:$0xff]  }
 0x12d   :  { %1430 = vmatpush2.bf16.msra.mxu0 %v2519_v33  ;;  %1456 = vmatprep.subr.bf16.mxu1 %v2530_v34  ;;  %v2611_v33 = vld [vmem:[#allocation6 + $0x30c] ss:$16 sps:$4 sm:$0xff]  }
 0x12e   :  { %1431 = vmatprep.subr.bf16.mxu0 %v2527_v35  ;;  %v2614_v34 = vld [vmem:[#allocation6 + $0x40c] ss:$16 sps:$4 sm:$0xff]   ;;  %v2609_v35 = vld [vmem:[#allocation6 + $0x308] ss:$16 sps:$4 sm:$0xff]  }
 0x130   :  { %1457 = vmatpush1.bf16.msra.mxu1 %v2528_v36  ;;  %v2612_v36 = vld [vmem:[#allocation6 + $0x408] ss:$16 sps:$4 sm:$0xff]  }
 0x131   :  { %1432 = vmatpush2.bf16.msra.mxu0 %v2525_v37  ;;  %1458 = vmatprep.subr.bf16.mxu1 %v2536_v38  ;;  %v2617_v37 = vld [vmem:[#allocation8 + $0x74] ss:$8 sps:$4 sm:$0xff]   ;;  %v2615_v38 = vld [vmem:[#allocation8 + $0x70] ss:$8 sps:$4 sm:$0xff]  }
 0x132   :  { %1433 = vmatprep.subr.bf16.mxu0 %v2533_v39  ;;  %v2620_v39 = vld [vmem:[#allocation8 + $0x64] ss:$8 sps:$4 sm:$0xff]  }
 0x134   :  { %1459 = vmatpush1.bf16.msra.mxu1 %v2534_v40  ;;  %v2618_v40 = vld [vmem:[#allocation8 + $0x60] ss:$8 sps:$4 sm:$0xff]  }
 0x135   :  { %1434 = vmatpush2.bf16.msra.mxu0 %v2531_v41  ;;  %1460 = vmatprep.subr.bf16.mxu1 %v2542_v42  ;;  %v2623_v41 = vld [vmem:[#allocation8 + $0x54] ss:$8 sps:$4 sm:$0xff]   ;;  %v2621_v42 = vld [vmem:[#allocation8 + $0x50] ss:$8 sps:$4 sm:$0xff]  }
 0x136   :  { %1435 = vmatprep.subr.bf16.mxu0 %v2539_v43  ;;  %v2626_v43 = vld [vmem:[#allocation8 + $0x44] ss:$8 sps:$4 sm:$0xff]  }
 0x138   :  { %1461 = vmatpush1.bf16.msra.mxu1 %v2540_v44  ;;  %v2624_v44 = vld [vmem:[#allocation8 + $0x40] ss:$8 sps:$4 sm:$0xff]  }
 0x139   :  { %1436 = vmatpush2.bf16.msra.mxu0 %v2537_v45  ;;  %1462 = vmatprep.subr.bf16.mxu1 %v2548_v46  ;;  %v2629_v45 = vld [vmem:[#allocation8 + $0x34] ss:$8 sps:$4 sm:$0xff]   ;;  %v2627_v46 = vld [vmem:[#allocation8 + $0x30] ss:$8 sps:$4 sm:$0xff]  }
 0x13a   :  { %1437 = vmatprep.subr.bf16.mxu0 %v2545_v47  ;;  %v2632_v47 = vld [vmem:[#allocation8 + $0x24] ss:$8 sps:$4 sm:$0xff]  }
 0x13c   :  { %1463 = vmatpush1.bf16.msra.mxu1 %v2546_v48  ;;  %v2633_v48 = vld [vmem:[#allocation8 + $0x10] ss:$8 sps:$4 sm:$0xff]  }
 0x13d   :  { %1438 = vmatpush2.bf16.msra.mxu0 %v2543_v50  ;;  %1464 = vmatprep.subr.bf16.mxu1 %v2554_v51  ;;  %v2638_v50 = vld [vmem:[#allocation8 + $0x4] ss:$8 sps:$4 sm:$0xff]   ;;  %v2636_v51 = vld [vmem:[#allocation8] ss:$8 sps:$4 sm:$0xff]  }
 0x13e   :  { %1439 = vmatprep.subr.bf16.mxu0 %v2551_v53  ;;  %v2667_v53 = vld [vmem:[#allocation8 + $0x174] ss:$8 sps:$4 sm:$0xff]  }
 0x140   :  { %1465 = vmatpush1.bf16.msra.mxu1 %v2552_v54  ;;  %v2641_v54 = vld [vmem:[#allocation8 + $0xf4] ss:$8 sps:$4 sm:$0xff]  }
 0x141   :  { %1440 = vmatpush2.bf16.msra.mxu0 %v2549_v55  ;;  %1466 = vmatprep.subr.bf16.mxu1 %v2560_v56  ;;  %v2665_v55 = vld [vmem:[#allocation8 + $0x170] ss:$8 sps:$4 sm:$0xff]  }
 0x142   :  { %1441 = vmatprep.subr.bf16.mxu0 %v2557_v57  ;;  %v2639_v56 = vld [vmem:[#allocation8 + $0xf0] ss:$8 sps:$4 sm:$0xff]   ;;  %v2670_v57 = vld [vmem:[#allocation8 + $0x164] ss:$8 sps:$4 sm:$0xff]  }
 0x144   :  { %1467 = vmatpush1.bf16.msra.mxu1 %v2558_v58  ;;  %v2644_v58 = vld [vmem:[#allocation8 + $0xe4] ss:$8 sps:$4 sm:$0xff]  }
 0x145   :  { %1442 = vmatpush2.bf16.msra.mxu0 %v2555_v59  ;;  %1468 = vmatprep.subr.bf16.mxu1 %v2566_v60  ;;  %v2668_v59 = vld [vmem:[#allocation8 + $0x160] ss:$8 sps:$4 sm:$0xff]  }
 0x146   :  { %1443 = vmatprep.subr.bf16.mxu0 %v2563_v61  ;;  %v2642_v60 = vld [vmem:[#allocation8 + $0xe0] ss:$8 sps:$4 sm:$0xff]   ;;  %v2673_v61 = vld [vmem:[#allocation8 + $0x154] ss:$8 sps:$4 sm:$0xff]  }
 0x148   :  { %1469 = vmatpush1.bf16.msra.mxu1 %v2564_v62  ;;  %v2647_v62 = vld [vmem:[#allocation8 + $0xd4] ss:$8 sps:$4 sm:$0xff]  }
 0x149   :  { %1444 = vmatpush2.bf16.msra.mxu0 %v2561_v63  ;;  %1470 = vmatprep.subr.bf16.mxu1 %v2569_v0  ;;  %v2671_v63 = vld [vmem:[#allocation8 + $0x150] ss:$8 sps:$4 sm:$0xff]  }
 0x14a   :  { %1495 = vmatprep.subr.bf16.mxu0 %v2572_v2  ;;  %v2645_v0 = vld [vmem:[#allocation8 + $0xd0] ss:$8 sps:$4 sm:$0xff]   ;;  %v2676_v2 = vld [vmem:[#allocation8 + $0x144] ss:$8 sps:$4 sm:$0xff]  }
 0x14c   :  { %1446 = vmatmul.mubr.bf16.vlgmr.msra.gmra.mxu0 %v2911_v52  ;;  %1471 = vmatpush2.bf16.msra.mxu1 %v2567_v3  ;;  %v2585_v52 = vld [vmem:[#allocation6 + $0x388] ss:$16 sps:$4 sm:$0xff]   ;;  %v2650_v3 = vld [vmem:[#allocation8 + $0xc4] ss:$8 sps:$4 sm:$0xff]  }
 0x14d   :  { %1496 = vmatpush1.bf16.msra.mxu0 %v2570_v4  ;;  %1472 = vmatprep.subr.bf16.mxu1 %v2575_v5  ;;  %v2674_v4 = vld [vmem:[#allocation8 + $0x140] ss:$8 sps:$4 sm:$0xff]   ;;  %v2679_v5 = vld [vmem:[#allocation8 + $0x134] ss:$8 sps:$4 sm:$0xff]  }
 0x14e   :  { %1497 = vmatprep.subr.bf16.mxu0 %v2578_v6  ;;  %1527 = vmatprep.mubr.bf16.mxu0 %v2812_v1  ;;  %v2594_v1 = vld [vmem:[#allocation6 + $0x468] ss:$16 sps:$4 sm:$0xff]  }
 0x14f   :  { %v2677_v6 = vld [vmem:[#allocation8 + $0x130] ss:$8 sps:$4 sm:$0xff]  }
 0x150   :  { %1473 = vmatpush2.bf16.msra.mxu1 %v2573_v7  ;;  %v2648_v7 = vld [vmem:[#allocation8 + $0xc0] ss:$8 sps:$4 sm:$0xff]  }
 0x151   :  { %1498 = vmatpush1.bf16.msra.mxu0 %v2576_v8  ;;  %1474 = vmatprep.subr.bf16.mxu1 %v2581_v9  ;;  %v2682_v8 = vld [vmem:[#allocation8 + $0x124] ss:$8 sps:$4 sm:$0xff]   ;;  %v2653_v9 = vld [vmem:[#allocation8 + $0xb4] ss:$8 sps:$4 sm:$0xff]  }
 0x152   :  { %1499 = vmatprep.subr.bf16.mxu0 %v2584_v10  ;;  %v2680_v10 = vld [vmem:[#allocation8 + $0x120] ss:$8 sps:$4 sm:$0xff]  }
 0x154   :  { %1475 = vmatpush2.bf16.msra.mxu1 %v2579_v11  ;;  %v2651_v11 = vld [vmem:[#allocation8 + $0xb0] ss:$8 sps:$4 sm:$0xff]  }
 0x155   :  { %1500 = vmatpush1.bf16.msra.mxu0 %v2582_v12  ;;  %1476 = vmatprep.subr.bf16.mxu1 %v2587_v13  ;;  %v2685_v12 = vld [vmem:[#allocation8 + $0x114] ss:$8 sps:$4 sm:$0xff]   ;;  %v2656_v13 = vld [vmem:[#allocation8 + $0xa4] ss:$8 sps:$4 sm:$0xff]  }
 0x156   :  { %1501 = vmatprep.subr.bf16.mxu0 %v2590_v14  ;;  %v2683_v14 = vld [vmem:[#allocation8 + $0x110] ss:$8 sps:$4 sm:$0xff]  }
 0x158   :  { %1477 = vmatpush2.bf16.msra.mxu1 %v2585_v52  ;;  %v2654_v52 = vld [vmem:[#allocation8 + $0xa0] ss:$8 sps:$4 sm:$0xff]  }
 0x159   :  { %1502 = vmatpush1.bf16.msra.mxu0 %v2588_v15  ;;  %1478 = vmatprep.subr.bf16.mxu1 %v2593_v16  ;;  %v2688_v15 = vld [vmem:[#allocation8 + $0x104] ss:$8 sps:$4 sm:$0xff]   ;;  %v2659_v16 = vld [vmem:[#allocation8 + $0x94] ss:$8 sps:$4 sm:$0xff]  }
 0x15a   :  { %1503 = vmatprep.subr.bf16.mxu0 %v2596_v17  ;;  %v2686_v17 = vld [vmem:[#allocation8 + $0x100] ss:$8 sps:$4 sm:$0xff]  }
 0x15c   :  { %1479 = vmatpush2.bf16.msra.mxu1 %v2591_v18  ;;  %v2657_v18 = vld [vmem:[#allocation8 + $0x90] ss:$8 sps:$4 sm:$0xff]  }
 0x15d   :  { %1504 = vmatpush1.bf16.msra.mxu0 %v2594_v1  ;;  %1480 = vmatprep.subr.bf16.mxu1 %v2599_v22  ;;  %v2662_v1 = vld [vmem:[#allocation8 + $0x84] ss:$8 sps:$4 sm:$0xff]   ;;  %v2660_v22 = vld [vmem:[#allocation8 + $0x80] ss:$8 sps:$4 sm:$0xff]  }
 0x15e   :  { %1505 = vmatprep.subr.bf16.mxu0 %v2602_v25  ;;  %v2691_v25 = vld [vmem:[#allocation8 + $0x1f4] ss:$8 sps:$4 sm:$0xff]  }
 0x160   :  { %1481 = vmatpush2.bf16.msra.mxu1 %v2597_v26  ;;  %v2689_v26 = vld [vmem:[#allocation8 + $0x1f0] ss:$8 sps:$4 sm:$0xff]  }
 0x161   :  { %1506 = vmatpush1.bf16.msra.mxu0 %v2600_v27  ;;  %1482 = vmatprep.subr.bf16.mxu1 %v2605_v28  ;;  %v2694_v27 = vld [vmem:[#allocation8 + $0x1e4] ss:$8 sps:$4 sm:$0xff]   ;;  %v2692_v28 = vld [vmem:[#allocation8 + $0x1e0] ss:$8 sps:$4 sm:$0xff]  }
 0x162   :  { %1507 = vmatprep.subr.bf16.mxu0 %v2608_v29  ;;  %v2697_v29 = vld [vmem:[#allocation8 + $0x1d4] ss:$8 sps:$4 sm:$0xff]  }
 0x164   :  { %1483 = vmatpush2.bf16.msra.mxu1 %v2603_v30  ;;  %v2695_v30 = vld [vmem:[#allocation8 + $0x1d0] ss:$8 sps:$4 sm:$0xff]  }
 0x165   :  { %1508 = vmatpush1.bf16.msra.mxu0 %v2606_v32  ;;  %1484 = vmatprep.subr.bf16.mxu1 %v2611_v33  ;;  %v2700_v32 = vld [vmem:[#allocation8 + $0x1c4] ss:$8 sps:$4 sm:$0xff]   ;;  %v2698_v33 = vld [vmem:[#allocation8 + $0x1c0] ss:$8 sps:$4 sm:$0xff]  }
 0x166   :  { %1509 = vmatprep.subr.bf16.mxu0 %v2614_v34  ;;  %v2703_v34 = vld [vmem:[#allocation8 + $0x1b4] ss:$8 sps:$4 sm:$0xff]  }
 0x168   :  { %1485 = vmatpush2.bf16.msra.mxu1 %v2609_v35  ;;  %v2701_v35 = vld [vmem:[#allocation8 + $0x1b0] ss:$8 sps:$4 sm:$0xff]  }
 0x169   :  { %1510 = vmatpush1.bf16.msra.mxu0 %v2612_v36  ;;  %1974 = vmatprep.subr.bf16.mxu1 %v2617_v37  ;;  %v2706_v36 = vld [vmem:[#allocation8 + $0x1a4] ss:$8 sps:$4 sm:$0xff]   ;;  %v2704_v37 = vld [vmem:[#allocation8 + $0x1a0] ss:$8 sps:$4 sm:$0xff]  }
 0x16a   :  { %2015 = vmatprep.subr.bf16.mxu0 %v2667_v53 }
 0x16b   :  { %1487 = vmatmul.mubr.bf16.vlgmr.msra.gmra.mxu1 %v2909_v49  ;;  %v2630_v49 = vld [vmem:[#allocation8 + $0x20] ss:$8 sps:$4 sm:$0xff]  }
 0x16c   :  { %1528 = vmatmul.mubr.bf16.vlgmr.msra.gmra.mxu0 %v2920_v31  ;;  %1975 = vmatpush1.bf16.msra.mxu1 %v2615_v38  ;;  %v2635_v31 = vld [vmem:[#allocation8 + $0x14] ss:$8 sps:$4 sm:$0xff]  }
 0x16d   :  { %1976 = vmatprep.subr.bf16.mxu1 %v2620_v39  ;;  %2016 = vmatpush1.bf16.msra.mxu0 %v2665_v55  ;;  %v2709_v38 = vld [vmem:[#allocation8 + $0x194] ss:$8 sps:$4 sm:$0xff]   ;;  %v2707_v39 = vld [vmem:[#allocation8 + $0x190] ss:$8 sps:$4 sm:$0xff]  }
 0x16e   :  { %2017 = vmatprep.subr.bf16.mxu0 %v2670_v57 }
 0x170   :  { %1977 = vmatpush1.bf16.msra.mxu1 %v2618_v40  ;;  %v2712_v40 = vld [vmem:[#allocation8 + $0x184] ss:$8 sps:$4 sm:$0xff]  }
 0x171   :  { %1978 = vmatprep.subr.bf16.mxu1 %v2623_v41  ;;  %2018 = vmatpush1.bf16.msra.mxu0 %v2668_v59  ;;  %v2710_v41 = vld [vmem:[#allocation8 + $0x180] ss:$8 sps:$4 sm:$0xff]  }
 0x172   :  { %2019 = vmatprep.subr.bf16.mxu0 %v2673_v61 }
 0x174   :  { %1979 = vmatpush1.bf16.msra.mxu1 %v2621_v42 }
 0x175   :  { %1980 = vmatprep.subr.bf16.mxu1 %v2626_v43  ;;  %2020 = vmatpush1.bf16.msra.mxu0 %v2671_v63  ;;  %v1558_v63 = vld [vmem:[%s2954_s1] sm:$0xff] }
 0x176   :  { %2021 = vmatprep.subr.bf16.mxu0 %v2676_v2 }
 0x178   :  { %1981 = vmatpush1.bf16.msra.mxu1 %v2624_v44 }
 0x179   :  { %1982 = vmatprep.subr.bf16.mxu1 %v2629_v45  ;;  %2022 = vmatpush1.bf16.msra.mxu0 %v2674_v4 }
 0x17a   :  { %2023 = vmatprep.subr.bf16.mxu0 %v2679_v5 }
 0x17c   :  { %1983 = vmatpush1.bf16.msra.mxu1 %v2627_v46 }
 0x17d   :  { %1984 = vmatprep.subr.bf16.mxu1 %v2632_v47  ;;  %2024 = vmatpush1.bf16.msra.mxu0 %v2677_v6 }
 0x17e   :  { %2025 = vmatprep.subr.bf16.mxu0 %v2682_v8 }
 0x180   :  { %1985 = vmatpush1.bf16.msra.mxu1 %v2630_v49 }
 0x181   :  { %1986 = vmatprep.subr.bf16.mxu1 %v2635_v31  ;;  %2026 = vmatpush1.bf16.msra.mxu0 %v2680_v10 }
 0x182   :  { %2027 = vmatprep.subr.bf16.mxu0 %v2685_v12 }
 0x184   :  { %1987 = vmatpush1.bf16.msra.mxu1 %v2633_v48  ;;  %v468_v48 = vld [vmem:[%s2958_s5] sm:$0xf] }
 0x185   :  { %1988 = vmatprep.subr.bf16.mxu1 %v2638_v50  ;;  %2028 = vmatpush1.bf16.msra.mxu0 %v2683_v14  ;;  %v473_v50 = vrot.slane %v468_v48, %v2893_v20  ;;  %v481_v12 = vrot.slane %v468_v48, %v105_v21 }
 0x186   :  { %2029 = vmatprep.subr.bf16.mxu0 %v2688_v15 }
 0x188   :  { %1989 = vmatpush1.bf16.msra.mxu1 %v2636_v51  ;;  %v477_v51 = vrot.slane %v468_v48, %v2900_v23 }
 0x189   :  { %1990 = vmatprep.subr.bf16.mxu1 %v2641_v54  ;;  %2030 = vmatpush1.bf16.msra.mxu0 %v2686_v17 }
 0x18a   :  { %2031 = vmatprep.subr.bf16.mxu0 %v2691_v25 }
 0x18c   :  { %1991 = vmatpush2.bf16.msra.mxu1 %v2639_v56 }
 0x18d   :  { %1992 = vmatprep.subr.bf16.mxu1 %v2644_v58  ;;  %2032 = vmatpush2.bf16.msra.mxu0 %v2689_v26 }
 0x18e   :  { %2033 = vmatprep.subr.bf16.mxu0 %v2694_v27 }
 0x190   :  { %1993 = vmatpush2.bf16.msra.mxu1 %v2642_v60 }
 0x191   :  { %1994 = vmatprep.subr.bf16.mxu1 %v2647_v62  ;;  %2034 = vmatpush2.bf16.msra.mxu0 %v2692_v28 }
 0x192   :  { %2035 = vmatprep.subr.bf16.mxu0 %v2697_v29 }
 0x194   :  { %1995 = vmatpush2.bf16.msra.mxu1 %v2645_v0 }
 0x195   :  { %1996 = vmatprep.subr.bf16.mxu1 %v2650_v3  ;;  %2036 = vmatpush2.bf16.msra.mxu0 %v2695_v30  ;;  %v1559_v3 = vpack.c.bf16 %v1558_v63, %v1558_v63 }
 0x196   :  { %2037 = vmatprep.subr.bf16.mxu0 %v2700_v32 }
 0x198   :  { %1997 = vmatpush2.bf16.msra.mxu1 %v2648_v7 }
 0x199   :  { %1998 = vmatprep.subr.bf16.mxu1 %v2653_v9  ;;  %2038 = vmatpush2.bf16.msra.mxu0 %v2698_v33 }
 0x19a   :  { %2039 = vmatprep.subr.bf16.mxu0 %v2703_v34 }
 0x19c   :  { %1999 = vmatpush2.bf16.msra.mxu1 %v2651_v11 }
 0x19d   :  { %2000 = vmatprep.subr.bf16.mxu1 %v2656_v13  ;;  %2040 = vmatpush2.bf16.msra.mxu0 %v2701_v35  ;;  %v485_v13 = vrot.slane %v468_v48, %v109_v24 }
 0x19e   :  { %2041 = vmatprep.subr.bf16.mxu0 %v2706_v36 }
 0x1a0   :  { %2001 = vmatpush2.bf16.msra.mxu1 %v2654_v52 }
 0x1a1   :  { %2002 = vmatprep.subr.bf16.mxu1 %v2659_v16  ;;  %2042 = vmatpush2.bf16.msra.mxu0 %v2704_v37  ;;  %v1628_v37 = vld [vmem:[%s2960_s7] sm:$0x3] }
 0x1a2   :  { %2043 = vmatprep.subr.bf16.mxu0 %v2709_v38  ;;  %v1633_v38 = vrot.slane %v1628_v37, %v2893_v20 }
 0x1a4   :  { %2003 = vmatpush2.bf16.msra.mxu1 %v2657_v18 }
 0x1a5   :  { %2004 = vmatprep.subr.bf16.mxu1 %v2662_v1  ;;  %2044 = vmatpush2.bf16.msra.mxu0 %v2707_v39  ;;  %v1637_v39 = vrot.slane %v1628_v37, %v2900_v23 }
 0x1a6   :  { %2045 = vmatprep.subr.bf16.mxu0 %v2712_v40 }
 0x1a8   :  { %2005 = vmatpush2.bf16.msra.mxu1 %v2660_v22 }
 0x1a9   :  { %2046 = vmatpush2.bf16.msra.mxu0 %v2710_v41 }
 0x1cb   :  { %v1324_v42 = vpop.f32.mrf.mxu1 }
 0x1cc   :  { %v1365_v43 = vpop.f32.mrf.mxu0  ;;  %v1325_v53 = vadd.f32 %v1324_v42, %v473_v50 }
 0x1cd   :  { %v1326_v44 = vpop.f32.mrf.mxu1 }
 0x1ce   :  { %v1367_v45 = vpop.f32.mrf.mxu0  ;;  %v1327_v54 = vadd.f32 %v1326_v44, %v477_v51  ;;  %v1366_v55 = vadd.f32 %v1365_v43, %v1325_v53 }
 0x1cf   :  { %v1328_v46 = vpop.f32.mrf.mxu1 }
 0x1d0   :  { %v1369_v47 = vpop.f32.mrf.mxu0  ;;  %v1368_v57 = vadd.f32 %v1367_v45, %v1327_v54 }
 0x1d1   :  { %v1329_v49 = vpop.f32.mrf.mxu1 }
 0x1d2   :  { %v1370_v31 = vpop.f32.mrf.mxu0  ;;  %v2058_v49 = vld [vmem:[%s2961_s8] sm:$0x3] }
 0x1d3   :  { %v2063_v31 = vrot.slane %v2058_v49, %v2893_v20  ;;  %v2067_v48 = vrot.slane %v2058_v49, %v2900_v23 }
 0x1eb   :  { %v1406_v56 = vpop.f32.mrf.mxu1 }
 0x1ec   :  { %v1407_v58 = vadd.f32 %v1406_v56, %v1366_v55  ;;  %v2335_v56 = vld [vmem:[#allocation3] ss:$0 sm:$0xff] }
 0x1ed   :  { %v1408_v59 = vpop.f32.mrf.mxu1 }
 0x1ee   :  { %v1409_v60 = vadd.f32 %v1408_v59, %v1368_v57  ;;  %2723 = vtanh.f32 %v1407_v58 }
 0x1ef   :  { %v1410_v61 = vpop.f32.mrf.mxu1 }
 0x1f0   :  { %2725 = vtanh.f32 %v1409_v60 }
 0x1f1   :  { %v1411_v62 = vpop.f32.mrf.mxu1 }
 0x1fb   :  { %v2724_v0 = vpop.eup %2723 }
 0x1fd   :  { %v2726_v2 = vpop.eup %2725 }
 0x1fe   :  { %v2336_v4 = vpack.c.bf16 %v2726_v2, %v2724_v0 }
 0x200   :  { %1556 = vst [vmem:[#allocation2] sm:$0xff] %v2336_v4 }
 0x201   :  { %1561 = vst.msk [vmem:[#allocation2] sm:$0xf] %vm1560_vm2, %v1559_v3 }
 0x208   :  { %v1562_v5 = vld [vmem:[#allocation2] sm:$0xff] }
 0x209   :  { %v2267_v6 = vcombine.low %v1562_v5, %v1562_v5  ;;  %v2268_v7 = vcombine.high %v1562_v5, %v1562_v5 }
 0x20b   :  { %2006 = vmatprep.mubr.bf16.mxu1 %v2268_v7 }
 0x20c   :  { %v1447_v8 = vpop.f32.mrf.mxu0  ;;  %2007 = vmatmul.mubr.bf16.vlgmr.msra.gmra.mxu1 %v2267_v6 }
 0x20d   :  { %v1448_v14 = vadd.f32 %v1447_v8, %v481_v12 }
 0x20e   :  { %v1449_v9 = vpop.f32.mrf.mxu0 }
 0x20f   :  { %v1450_v15 = vadd.f32 %v1449_v9, %v485_v13 }
 0x210   :  { %v1451_v10 = vpop.f32.mrf.mxu0 }
 0x212   :  { %v1452_v11 = vpop.f32.mrf.mxu0 }
 0x22b   :  { %v1488_v52 = vpop.f32.mrf.mxu1 }
 0x22c   :  { %v1489_v16 = vadd.f32 %v1488_v52, %v1448_v14  ;;  %v1529_v17 = vpop.f32.mrf.mxu0 }
 0x22d   :  { %v1490_v18 = vpop.f32.mrf.mxu1 }
 0x22e   :  { %v1530_v1 = vadd.f32 %v1529_v17, %v1489_v16  ;;  %v1491_v22 = vadd.f32 %v1490_v18, %v1450_v15  ;;  %v1531_v25 = vpop.f32.mrf.mxu0 }
 0x22f   :  { %v1492_v26 = vpop.f32.mrf.mxu1 }
 0x230   :  { %v1532_v27 = vadd.f32 %v1531_v25, %v1491_v22  ;;  %v1533_v28 = vpop.f32.mrf.mxu0  ;;  %2727 = vtanh.f32 %v1530_v1 }
 0x231   :  { %v1493_v29 = vpop.f32.mrf.mxu1 }
 0x232   :  { %2729 = vtanh.f32 %v1532_v27  ;;  %v1534_v30 = vpop.f32.mrf.mxu0 }
 0x23d   :  { %v2728_v21 = vpop.eup %2727 }
 0x23e   :  { %v2737_v19 = vpack.c.bf16 %v2728_v21, %v2728_v21 }
 0x23f   :  { %v2730_v32 = vpop.eup %2729 }
 0x240   :  { %v2738_v24 = vpack.c.bf16 %v2730_v32, %v2730_v32 }
 0x242   :  { %2047 = vmatprep.mubr.bf16.mxu0 %v2738_v24 }
 0x243   :  { %2048 = vmatmul.mubr.bf16.vlgmr.msra.gmra.mxu0 %v2737_v19 }
 0x2cc   :  { %v2008_v33 = vpop.f32.mrf.mxu1 }
 0x2cd   :  { %v2009_v40 = vadd.f32 %v2008_v33, %v1633_v38 }
 0x2ce   :  { %v2010_v34 = vpop.f32.mrf.mxu1 }
 0x2cf   :  { %v2011_v42 = vadd.f32 %v2010_v34, %v1637_v39 }
 0x2d0   :  { %v2012_v35 = vpop.f32.mrf.mxu1 }
 0x2d2   :  { %v2013_v36 = vpop.f32.mrf.mxu1 }
 0x303   :  { %v2049_v41 = vpop.f32.mrf.mxu0 }
 0x304   :  { %v2050_v43 = vadd.f32 %v2049_v41, %v2009_v40 }
 0x305   :  { %v2051_v44 = vpop.f32.mrf.mxu0 }
 0x306   :  { %2731 = vtanh.f32 %v2050_v43  ;;  %v2052_v45 = vadd.f32 %v2051_v44, %v2011_v42 }
 0x307   :  { %v2053_v46 = vpop.f32.mrf.mxu0 }
 0x308   :  { %2733 = vtanh.f32 %v2052_v45 }
 0x309   :  { %v2054_v47 = vpop.f32.mrf.mxu0 }
 0x313   :  { %v2732_v50 = vpop.eup %2731 }
 0x314   :  { %v2070_v53 = vmul.f32 %v2732_v50, %v2063_v31 }
 0x315   :  { %v2734_v51 = vpop.eup %2733 }
 0x316   :  { %v2071_v54 = vmul.f32 %v2734_v51, %v2067_v48 }
 0x318   :  { %v2072_v55 = vadd.f32 %v2071_v54, %v2070_v53 }
 0x31a   :  { %2073 = vadd.xlane.f32.xlu0 %v2072_v55 }
 0x3a3   :  { %v2074_v57 = vpop.xlane.xlu0 %2073 }
 0x3a4   :  { %v2082_v58 = vadd.f32 %v2335_v56, %v2074_v57 }
 0x3a6   :  { %2735 = vtanh.f32 %v2082_v58 }
 0x3b3   :  { %v2736_v59 = vpop.eup %2735 }
 0x3b4   :  { %2085 = vst.msk [vmem:[%s2963_s10] sm:$0xff] %vm2084_vm3, %v2736_v59 }
 0x3b5   :  { %2090 = vsyncpa [#allocation5], 1 }
 0x3b6   :  { %2091 = vsyncpa [#allocation7], 1 }

</bundles_post_ra>
